<compile_context>
chip_gen: v5e
topology: v5e:2x2
jax: 0.10.0
libtpu: 0.0.40
codegen_flags: <defaults>
</compile_context>

<pallas_src>
import functools

import jax
import jax.numpy as jnp
from jax.experimental import pallas as pl
from jax.experimental.pallas import tpu as pltpu

LANE = 128      # vreg lane width  -> layer OUTPUT dims padded to multiples of this
SUBLANE = 8     # vreg sublane cnt
_MIB = 1024 * 1024


def _round_up(n, m):
    return ((n + m - 1) // m) * m


def _vmem_capacity_bytes():
    try:
        return int(pltpu.get_tpu_info().vmem_capacity_bytes)
    except Exception:
        return 64 * _MIB  # conservative fallback: v7x per-TensorCore VMEM


def _mlp_kernel(n_layers, *refs):
    """Fused MLP body. refs = (x, w0, b0, w1, b1, ..., w_{L-1}, b_{L-1}, out)."""
    x_ref = refs[0]
    o_ref = refs[-1]
    h = x_ref[...]                                    # (tm, in_dim) f32, stays in VMEM/vregs
    for i in range(n_layers):                         # static unroll over layers
        w_ref = refs[1 + 2 * i]
        b_ref = refs[2 + 2 * i]
        y = jnp.dot(h, w_ref[...], preferred_element_type=jnp.float32)  # MXU, f32 acc
        y = y + b_ref[...]                            # (1, n_p) broadcasts over rows
        if i < n_layers - 1:
            y = jnp.maximum(y, 0.0)                   # ReLU on hidden layers only
        h = y
    o_ref[...] = h.astype(o_ref.dtype)                # lane-dense store (n_p % 128 == 0)


class FullyConnectedMLP:
    """JAX/Pallas port of the PyTorch FullyConnectedMLP module (single fused kernel)."""

    def __init__(self, input_shape, hiddens, output_shape, key):
        assert isinstance(hiddens, list)
        self.input_shape = (input_shape,)
        self.output_shape = (output_shape,)
        self.hiddens = hiddens

        dims = [input_shape] + hiddens + [output_shape]
        self._dims = dims
        # Layer-i weight is (K_i, N_i_padded). K_0 stays the TRUE input dim so x
        # needs no feature padding / copy; K_{i>0} equals the padded width of the
        # previous layer's (zero-padded) activations. Every N is lane-padded.
        self._n_pad = [_round_up(d, LANE) for d in dims[1:]]
        self._k_dims = [dims[0]] + self._n_pad[:-1]

        # Unpadded params (used by the pure-JAX reference) ...
        self.params = []
        for i in range(len(dims) - 1):
            fan_in, fan_out = dims[i], dims[i + 1]
            key, wk, bk = jax.random.split(key, 3)
            bound = 1.0 / jnp.sqrt(jnp.float32(fan_in))   # torch.nn.Linear default init bound
            w = jax.random.uniform(wk, (fan_in, fan_out), jnp.float32, -bound, bound)
            b = jax.random.uniform(bk, (1, fan_out), jnp.float32, -bound, bound)
            self.params.append((w, b))

        # ... and zero-padded, lane-aligned copies used by the kernel.
        # Zero padding is exact: padded weight rows multiply zero activation columns,
        # padded bias entries are 0 and ReLU(0)=0, so padded columns stay 0 throughout.
        self.padded_params = []
        for i, (w, b) in enumerate(self.params):
            k_p, n_p = self._k_dims[i], self._n_pad[i]
            w_p = jnp.zeros((k_p, n_p), jnp.float32).at[: dims[i], : dims[i + 1]].set(w)
            b_p = jnp.zeros((1, n_p), jnp.float32).at[:, : dims[i + 1]].set(b)
            self.padded_params.append((w_p, b_p))

        self._param_bytes = 4 * sum(w.size + b.size for w, b in self.padded_params)
        self._max_width = max([dims[0]] + self._n_pad)
        self._single_buffer_ok = None   # cached: does this JAX build accept pl.Buffered(1)?

    # ------------------------------------------------------------------ helpers
    def _vmem_estimate(self, tm, weight_buffers):
        in_dim, out_p = self._dims[0], self._n_pad[-1]
        io_bytes = 4 * 2 * tm * (in_dim + out_p)          # double-buffered x / out tiles
        act_bytes = 4 * 2 * tm * self._max_width          # live intermediate activation slabs
        return weight_buffers * self._param_bytes + io_bytes + act_bytes

    def _pick_tile(self, B, vmem_cap):
        if B <= LANE:
            return max(B, 1)                              # full-batch block: no batch padding
        tm = 512 if B >= 512 else (256 if B >= 256 else 128)
        while tm > 128 and int(1.25 * self._vmem_estimate(tm, 2)) > vmem_cap:
            tm //= 2                                      # shrink if it cannot fit VMEM
        return tm

    def _pallas_forward(self, x2d, tm, vmem_limit, single_buffer_weights):
        B, in_dim = x2d.shape
        out_p = self._n_pad[-1]
        n_layers = len(self.padded_params)
        num_tiles = pl.cdiv(B, tm)

        stationary_kwargs = (
            {"pipeline_mode": pl.Buffered(1)} if single_buffer_weights else {}
        )
        flat_params = []
        in_specs = [pl.BlockSpec((tm, in_dim), lambda i: (i, 0))]      # streamed x tiles
        for w_p, b_p in self.padded_params:
            flat_params += [w_p, b_p]
            in_specs += [
                pl.BlockSpec(w_p.shape, lambda i: (0, 0), **stationary_kwargs),  # weight-stationary
                pl.BlockSpec(b_p.shape, lambda i: (0, 0), **stationary_kwargs),  # bias-stationary
            ]
        out_specs = pl.BlockSpec((tm, out_p), lambda i: (i, 0))

        flops = 2 * B * sum(k * n for k, n in zip(self._k_dims, self._n_pad))
        bytes_accessed = 4 * (x2d.size + B * out_p) + self._param_bytes

        return pl.pallas_call(
            functools.partial(_mlp_kernel, n_layers),
            out_shape=jax.ShapeDtypeStruct((B, out_p), jnp.float32),
            grid=(num_tiles,),
            in_specs=in_specs,
            out_specs=out_specs,
            compiler_params=pltpu.CompilerParams(
                dimension_semantics=("parallel",),       # shards the batch axis over 2 TCs on v7x
                vmem_limit_bytes=vmem_limit,
            ),
            cost_estimate=pl.CostEstimate(
                flops=flops, transcendentals=0, bytes_accessed=bytes_accessed
            ),
        )(x2d, *flat_params)

    # ------------------------------------------------------------------ forward
    def __call__(self, x):
        B = x.shape[0]
        x2d = x.reshape(B, -1).astype(jnp.float32)        # flatten (glue, plain JAX; no padding)
        out_dim = self._dims[-1]

        vmem_cap = int(0.80 * _vmem_capacity_bytes())     # ~51 MiB on v7x, ~102 MiB on v5e/v6e
        tm = self._pick_tile(B, vmem_cap)

        nbuf = 1 if self._single_buffer_ok in (None, True) else 2
        vmem_limit = min(max(int(1.25 * self._vmem_estimate(tm, nbuf)), 32 * _MIB), vmem_cap)

        if self._single_buffer_ok is None:
            try:
                out = self._pallas_forward(x2d, tm, vmem_limit, single_buffer_weights=True)
                self._single_buffer_ok = True
            except Exception:
                # TODO(synk): this JAX build rejected pl.Buffered(1) on stationary inputs;
                # fall back to default double-buffered weights (previous known-good path).
                self._single_buffer_ok = False
                vmem_limit = min(
                    max(int(1.25 * self._vmem_estimate(tm, 2)), 32 * _MIB), vmem_cap
                )
                out = self._pallas_forward(x2d, tm, vmem_limit, single_buffer_weights=False)
        else:
            out = self._pallas_forward(
                x2d, tm, vmem_limit, single_buffer_weights=self._single_buffer_ok
            )

        # Strip lane padding on the output features (glue, plain JAX).
        return out[:, :out_dim].reshape(B, *self.output_shape)


def _reference_forward(x, params):
    batch_size = x.shape[0]
    x = x.reshape(batch_size, -1)
    n_layers = len(params)
    for i, (w, b) in enumerate(params):
        x = x @ w + b
        if i < n_layers - 1:
            x = jnp.maximum(x, 0.0)
    return x


if __name__ == "__main__":
    key = jax.random.PRNGKey(0)
    key, pkey, xkey = jax.random.split(key, 3)

    input_dim = 16
    hiddens = [32, 32]
    output_dim = 8
    batch = 2

    mlp = FullyConnectedMLP(input_dim, hiddens, output_dim, pkey)

    x = jax.random.normal(xkey, (batch, input_dim), jnp.float32)

    out = mlp(x)
    out = jax.block_until_ready(out)

    ref = _reference_forward(x, mlp.params)
    assert out.shape == (batch, output_dim), out.shape
    assert jnp.allclose(out, ref, atol=1e-5, rtol=1e-5), "mismatch vs reference"

    print("KERNEL_OK")
</pallas_src>

<mosaic_0001>
module attributes {stable_mosaic.version = 11 : i64} {
  func.func @_mlp_kernel(%arg0: i32, %arg1: memref<2x16xf32, #tpu.memory_space<vmem>>, %arg2: memref<16x128xf32, #tpu.memory_space<vmem>>, %arg3: memref<1x128xf32, #tpu.memory_space<vmem>>, %arg4: memref<128x128xf32, #tpu.memory_space<vmem>>, %arg5: memref<1x128xf32, #tpu.memory_space<vmem>>, %arg6: memref<128x128xf32, #tpu.memory_space<vmem>>, %arg7: memref<1x128xf32, #tpu.memory_space<vmem>>, %arg8: memref<2x128xf32, #tpu.memory_space<vmem>>) attributes {dimension_semantics = [#tpu.dimension_semantics<parallel>], iteration_bounds = array<i64: 1>, scalar_prefetch = 0 : i64, scratch_operands = 0 : i64, tpu.core_type = #tpu.core_type<tc>, window_params = [{transform_indices = @transform_0, window_bounds = array<i64: 2, 16>}, {pipeline_mode = #tpu.pipeline_mode<synchronous>, transform_indices = @transform_1, window_bounds = array<i64: 16, 128>}, {pipeline_mode = #tpu.pipeline_mode<synchronous>, transform_indices = @transform_2, window_bounds = array<i64: 1, 128>}, {pipeline_mode = #tpu.pipeline_mode<synchronous>, transform_indices = @transform_3, window_bounds = array<i64: 128, 128>}, {pipeline_mode = #tpu.pipeline_mode<synchronous>, transform_indices = @transform_4, window_bounds = array<i64: 1, 128>}, {pipeline_mode = #tpu.pipeline_mode<synchronous>, transform_indices = @transform_5, window_bounds = array<i64: 128, 128>}, {pipeline_mode = #tpu.pipeline_mode<synchronous>, transform_indices = @transform_6, window_bounds = array<i64: 1, 128>}, {transform_indices = @transform_7, window_bounds = array<i64: 2, 128>}]} {
    %c0 = arith.constant 0 : index
    %c0_0 = arith.constant 0 : index
    %0 = vector.load %arg1[%c0, %c0_0] : memref<2x16xf32, #tpu.memory_space<vmem>>, vector<2x16xf32>
    %c0_1 = arith.constant 0 : index
    %c0_2 = arith.constant 0 : index
    %1 = vector.load %arg2[%c0_1, %c0_2] : memref<16x128xf32, #tpu.memory_space<vmem>>, vector<16x128xf32>
    %cst = arith.constant dense<0.000000e+00> : vector<2x128xf32>
    %2 = tpu.matmul %0, %1, %cst {dimension_numbers = #tpu.dot_dimension_numbers<[1], [0], [0], [1], [0, 0, 1, 1], [], []>} : vector<2x16xf32>, vector<16x128xf32>, vector<2x128xf32> -> vector<2x128xf32>
    %c0_3 = arith.constant 0 : index
    %c0_4 = arith.constant 0 : index
    %3 = vector.load %arg3[%c0_3, %c0_4] : memref<1x128xf32, #tpu.memory_space<vmem>>, vector<1x128xf32>
    %4 = vector.broadcast %3 : vector<1x128xf32> to vector<2x128xf32>
    %5 = arith.addf %2, %4 : vector<2x128xf32>
    %cst_5 = arith.constant 0.000000e+00 : f32
    %6 = vector.broadcast %cst_5 : f32 to vector<2x128xf32>
    %7 = arith.maximumf %5, %6 : vector<2x128xf32>
    %c0_6 = arith.constant 0 : index
    %c0_7 = arith.constant 0 : index
    %8 = vector.load %arg4[%c0_6, %c0_7] : memref<128x128xf32, #tpu.memory_space<vmem>>, vector<128x128xf32>
    %cst_8 = arith.constant dense<0.000000e+00> : vector<2x128xf32>
    %9 = tpu.matmul %7, %8, %cst_8 {dimension_numbers = #tpu.dot_dimension_numbers<[1], [0], [0], [1], [0, 0, 1, 1], [], []>} : vector<2x128xf32>, vector<128x128xf32>, vector<2x128xf32> -> vector<2x128xf32>
    %c0_9 = arith.constant 0 : index
    %c0_10 = arith.constant 0 : index
    %10 = vector.load %arg5[%c0_9, %c0_10] : memref<1x128xf32, #tpu.memory_space<vmem>>, vector<1x128xf32>
    %11 = vector.broadcast %10 : vector<1x128xf32> to vector<2x128xf32>
    %12 = arith.addf %9, %11 : vector<2x128xf32>
    %cst_11 = arith.constant 0.000000e+00 : f32
    %13 = vector.broadcast %cst_11 : f32 to vector<2x128xf32>
    %14 = arith.maximumf %12, %13 : vector<2x128xf32>
    %c0_12 = arith.constant 0 : index
    %c0_13 = arith.constant 0 : index
    %15 = vector.load %arg6[%c0_12, %c0_13] : memref<128x128xf32, #tpu.memory_space<vmem>>, vector<128x128xf32>
    %cst_14 = arith.constant dense<0.000000e+00> : vector<2x128xf32>
    %16 = tpu.matmul %14, %15, %cst_14 {dimension_numbers = #tpu.dot_dimension_numbers<[1], [0], [0], [1], [0, 0, 1, 1], [], []>} : vector<2x128xf32>, vector<128x128xf32>, vector<2x128xf32> -> vector<2x128xf32>
    %c0_15 = arith.constant 0 : index
    %c0_16 = arith.constant 0 : index
    %17 = vector.load %arg7[%c0_15, %c0_16] : memref<1x128xf32, #tpu.memory_space<vmem>>, vector<1x128xf32>
    %18 = vector.broadcast %17 : vector<1x128xf32> to vector<2x128xf32>
    %19 = arith.addf %16, %18 : vector<2x128xf32>
    %c0_17 = arith.constant 0 : index
    %c0_18 = arith.constant 0 : index
    %20 = vector.load %arg8[%c0_17, %c0_18] : memref<2x128xf32, #tpu.memory_space<vmem>>, vector<2x128xf32>
    tpu.vector_store %arg8[%c0_17, %c0_18], %19 {strides = array<i32>} : memref<2x128xf32, #tpu.memory_space<vmem>>, vector<2x128xf32>,
    return
  }
  func.func @transform_0(%arg0: i32) -> (i32, i32) {
    %c0_i32 = arith.constant 0 : i32
    %c0_i32_0 = arith.constant 0 : i32
    return %arg0, %c0_i32 : i32, i32
  }
  func.func @transform_1(%arg0: i32) -> (i32, i32) {
    %c0_i32 = arith.constant 0 : i32
    %c0_i32_0 = arith.constant 0 : i32
    %c0_i32_1 = arith.constant 0 : i32
    return %c0_i32, %c0_i32_0 : i32, i32
  }
  func.func @transform_2(%arg0: i32) -> (i32, i32) {
    %c0_i32 = arith.constant 0 : i32
    %c0_i32_0 = arith.constant 0 : i32
    %c0_i32_1 = arith.constant 0 : i32
    return %c0_i32, %c0_i32_0 : i32, i32
  }
  func.func @transform_3(%arg0: i32) -> (i32, i32) {
    %c0_i32 = arith.constant 0 : i32
    %c0_i32_0 = arith.constant 0 : i32
    %c0_i32_1 = arith.constant 0 : i32
    return %c0_i32, %c0_i32_0 : i32, i32
  }
  func.func @transform_4(%arg0: i32) -> (i32, i32) {
    %c0_i32 = arith.constant 0 : i32
    %c0_i32_0 = arith.constant 0 : i32
    %c0_i32_1 = arith.constant 0 : i32
    return %c0_i32, %c0_i32_0 : i32, i32
  }
  func.func @transform_5(%arg0: i32) -> (i32, i32) {
    %c0_i32 = arith.constant 0 : i32
    %c0_i32_0 = arith.constant 0 : i32
    %c0_i32_1 = arith.constant 0 : i32
    return %c0_i32, %c0_i32_0 : i32, i32
  }
  func.func @transform_6(%arg0: i32) -> (i32, i32) {
    %c0_i32 = arith.constant 0 : i32
    %c0_i32_0 = arith.constant 0 : i32
    %c0_i32_1 = arith.constant 0 : i32
    return %c0_i32, %c0_i32_0 : i32, i32
  }
  func.func @transform_7(%arg0: i32) -> (i32, i32) {
    %c0_i32 = arith.constant 0 : i32
    %c0_i32_0 = arith.constant 0 : i32
    return %arg0, %c0_i32 : i32, i32
  }
}

module attributes {stable_mosaic.version = 11 : i64} {
  func.func @_mlp_kernel(%arg0: i32, %arg1: memref<2x16xf32, #tpu.memory_space<vmem>>, %arg2: memref<16x128xf32, #tpu.memory_space<vmem>>, %arg3: memref<1x128xf32, #tpu.memory_space<vmem>>, %arg4: memref<128x128xf32, #tpu.memory_space<vmem>>, %arg5: memref<1x128xf32, #tpu.memory_space<vmem>>, %arg6: memref<128x128xf32, #tpu.memory_space<vmem>>, %arg7: memref<1x128xf32, #tpu.memory_space<vmem>>, %arg8: memref<2x128xf32, #tpu.memory_space<vmem>>) attributes {dimension_semantics = [#tpu.dimension_semantics<parallel>], iteration_bounds = array<i64: 1>, scalar_prefetch = 0 : i64, scratch_operands = 0 : i64, tpu.core_type = #tpu.core_type<tc>, window_params = [{transform_indices = @transform_0, window_bounds = array<i64: 2, 16>}, {pipeline_mode = #tpu.pipeline_mode<synchronous>, transform_indices = @transform_1, window_bounds = array<i64: 16, 128>}, {pipeline_mode = #tpu.pipeline_mode<synchronous>, transform_indices = @transform_2, window_bounds = array<i64: 1, 128>}, {pipeline_mode = #tpu.pipeline_mode<synchronous>, transform_indices = @transform_3, window_bounds = array<i64: 128, 128>}, {pipeline_mode = #tpu.pipeline_mode<synchronous>, transform_indices = @transform_4, window_bounds = array<i64: 1, 128>}, {pipeline_mode = #tpu.pipeline_mode<synchronous>, transform_indices = @transform_5, window_bounds = array<i64: 128, 128>}, {pipeline_mode = #tpu.pipeline_mode<synchronous>, transform_indices = @transform_6, window_bounds = array<i64: 1, 128>}, {transform_indices = @transform_7, window_bounds = array<i64: 2, 128>}]} {
    %c0 = arith.constant 0 : index
    %c0_0 = arith.constant 0 : index
    %0 = vector.load %arg1[%c0, %c0_0] : memref<2x16xf32, #tpu.memory_space<vmem>>, vector<2x16xf32>
    %c0_1 = arith.constant 0 : index
    %c0_2 = arith.constant 0 : index
    %1 = vector.load %arg2[%c0_1, %c0_2] : memref<16x128xf32, #tpu.memory_space<vmem>>, vector<16x128xf32>
    %cst = arith.constant dense<0.000000e+00> : vector<2x128xf32>
    %2 = tpu.matmul %0, %1, %cst {dimension_numbers = #tpu.dot_dimension_numbers<[1], [0], [0], [1], [0, 0, 1, 1], [], []>} : vector<2x16xf32>, vector<16x128xf32>, vector<2x128xf32> -> vector<2x128xf32>
    %c0_3 = arith.constant 0 : index
    %c0_4 = arith.constant 0 : index
    %3 = vector.load %arg3[%c0_3, %c0_4] : memref<1x128xf32, #tpu.memory_space<vmem>>, vector<1x128xf32>
    %4 = vector.broadcast %3 : vector<1x128xf32> to vector<2x128xf32>
    %5 = arith.addf %2, %4 : vector<2x128xf32>
    %cst_5 = arith.constant 0.000000e+00 : f32
    %6 = vector.broadcast %cst_5 : f32 to vector<2x128xf32>
    %7 = arith.maximumf %5, %6 : vector<2x128xf32>
    %c0_6 = arith.constant 0 : index
    %c0_7 = arith.constant 0 : index
    %8 = vector.load %arg4[%c0_6, %c0_7] : memref<128x128xf32, #tpu.memory_space<vmem>>, vector<128x128xf32>
    %cst_8 = arith.constant dense<0.000000e+00> : vector<2x128xf32>
    %9 = tpu.matmul %7, %8, %cst_8 {dimension_numbers = #tpu.dot_dimension_numbers<[1], [0], [0], [1], [0, 0, 1, 1], [], []>} : vector<2x128xf32>, vector<128x128xf32>, vector<2x128xf32> -> vector<2x128xf32>
    %c0_9 = arith.constant 0 : index
    %c0_10 = arith.constant 0 : index
    %10 = vector.load %arg5[%c0_9, %c0_10] : memref<1x128xf32, #tpu.memory_space<vmem>>, vector<1x128xf32>
    %11 = vector.broadcast %10 : vector<1x128xf32> to vector<2x128xf32>
    %12 = arith.addf %9, %11 : vector<2x128xf32>
    %cst_11 = arith.constant 0.000000e+00 : f32
    %13 = vector.broadcast %cst_11 : f32 to vector<2x128xf32>
    %14 = arith.maximumf %12, %13 : vector<2x128xf32>
    %c0_12 = arith.constant 0 : index
    %c0_13 = arith.constant 0 : index
    %15 = vector.load %arg6[%c0_12, %c0_13] : memref<128x128xf32, #tpu.memory_space<vmem>>, vector<128x128xf32>
    %cst_14 = arith.constant dense<0.000000e+00> : vector<2x128xf32>
    %16 = tpu.matmul %14, %15, %cst_14 {dimension_numbers = #tpu.dot_dimension_numbers<[1], [0], [0], [1], [0, 0, 1, 1], [], []>} : vector<2x128xf32>, vector<128x128xf32>, vector<2x128xf32> -> vector<2x128xf32>
    %c0_15 = arith.constant 0 : index
    %c0_16 = arith.constant 0 : index
    %17 = vector.load %arg7[%c0_15, %c0_16] : memref<1x128xf32, #tpu.memory_space<vmem>>, vector<1x128xf32>
    %18 = vector.broadcast %17 : vector<1x128xf32> to vector<2x128xf32>
    %19 = arith.addf %16, %18 : vector<2x128xf32>
    %c0_17 = arith.constant 0 : index
    %c0_18 = arith.constant 0 : index
    %20 = vector.load %arg8[%c0_17, %c0_18] : memref<2x128xf32, #tpu.memory_space<vmem>>, vector<2x128xf32>
    tpu.vector_store %arg8[%c0_17, %c0_18], %19 {strides = array<i32>} : memref<2x128xf32, #tpu.memory_space<vmem>>, vector<2x128xf32>,
    return
  }
  func.func @transform_0(%arg0: i32) -> (i32, i32) {
    %c0_i32 = arith.constant 0 : i32
    %c0_i32_0 = arith.constant 0 : i32
    return %arg0, %c0_i32 : i32, i32
  }
  func.func @transform_1(%arg0: i32) -> (i32, i32) {
    %c0_i32 = arith.constant 0 : i32
    %c0_i32_0 = arith.constant 0 : i32
    %c0_i32_1 = arith.constant 0 : i32
    return %c0_i32, %c0_i32_0 : i32, i32
  }
  func.func @transform_2(%arg0: i32) -> (i32, i32) {
    %c0_i32 = arith.constant 0 : i32
    %c0_i32_0 = arith.constant 0 : i32
    %c0_i32_1 = arith.constant 0 : i32
    return %c0_i32, %c0_i32_0 : i32, i32
  }
  func.func @transform_3(%arg0: i32) -> (i32, i32) {
    %c0_i32 = arith.constant 0 : i32
    %c0_i32_0 = arith.constant 0 : i32
    %c0_i32_1 = arith.constant 0 : i32
    return %c0_i32, %c0_i32_0 : i32, i32
  }
  func.func @transform_4(%arg0: i32) -> (i32, i32) {
    %c0_i32 = arith.constant 0 : i32
    %c0_i32_0 = arith.constant 0 : i32
    %c0_i32_1 = arith.constant 0 : i32
    return %c0_i32, %c0_i32_0 : i32, i32
  }
  func.func @transform_5(%arg0: i32) -> (i32, i32) {
    %c0_i32 = arith.constant 0 : i32
    %c0_i32_0 = arith.constant 0 : i32
    %c0_i32_1 = arith.constant 0 : i32
    return %c0_i32, %c0_i32_0 : i32, i32
  }
  func.func @transform_6(%arg0: i32) -> (i32, i32) {
    %c0_i32 = arith.constant 0 : i32
    %c0_i32_0 = arith.constant 0 : i32
    %c0_i32_1 = arith.constant 0 : i32
    return %c0_i32, %c0_i32_0 : i32, i32
  }
  func.func @transform_7(%arg0: i32) -> (i32, i32) {
    %c0_i32 = arith.constant 0 : i32
    %c0_i32_0 = arith.constant 0 : i32
    return %arg0, %c0_i32 : i32, i32
  }
}

</mosaic_0001>

<bundles_post_ra>
// kernel: tpu_custom_call.1
= control target key start
LH: loop header
LB: loop body
LE: loop exit
PB: predicated region body
PF: predicated region fallthrough
CT: control target
= control target key end

     0   :  { %12 = vsyncpa [#allocation3], 0  ;;  %s431_s0 = inlined_call_operand.hbm [shape: f32[2,16], index: 0, kind: input, shape index: {}]   ;;  %s432_s1 = inlined_call_operand.hbm [shape: f32[16,128], index: 1, kind: input, shape index: {}]   ;;  %s433_s2 = inlined_call_operand.vmem [shape: f32[1,128], index: 2, kind: input, shape index: {}]   ;;  %s434_s3 = inlined_call_operand.hbm [shape: f32[128,128], index: 3, kind: input, shape index: {}]   ;;  %s435_s4 = inlined_call_operand.vmem [shape: f32[1,128], index: 4, kind: input, shape index: {}]   ;;  %s436_s5 = inlined_call_operand.hbm [shape: f32[128,128], index: 5, kind: input, shape index: {}]   ;;  %s437_s6 = inlined_call_operand.vmem [shape: f32[1,128], index: 6, kind: input, shape index: {}]   ;;  %s438_s7 = inlined_call_operand.hbm [shape: f32[2,128], index: 7, kind: output, shape index: {}]  }
   0x1   :  { %13 = vsyncpa [#allocation6], 0 }
   0x2   :  { %14 = vsyncpa [#allocation9], 0  ;;  %s31_s26 = sshll.u32 %s432_s1, 4  ;;  %s32_s26 = int_to_ptr.hbm [resolvable:$true] %s31_s26 }
   0x3   :  { %15 = vsyncpa [#allocation4], 0  ;;  %s360_s27 = smov [#allocation5]   ;;  %s21_s8 = sshll.u32 %s431_s0, 4  ;;  %s22_s8 = int_to_ptr.hbm [resolvable:$true] %s21_s8 }
   0x4   :  { %s33_s28 = sshll.u32 %s360_s27, 4  ;;  %s361_s9 = smov 128   ;;  %s34_s28 = int_to_ptr.vmem [resolvable:$true] %s33_s28 }
   0x5   :  { %s362_s10 = smov 8   ;;  %s363_s11 = smov [#allocation2]  }
   0x6   :  { %39 = dma.hbm_to_vmem [thread:$0]  %s32_s26, 256, %s34_s28, [#allocation6], %s361_s9, %s361_s9, %s362_s10  }
   0x7   :  { %s23_s12 = sshll.u32 %s363_s11, 4  ;;  %s46_s15 = sshll.u32 %s434_s3, 4  ;;  %s24_s12 = int_to_ptr.vmem [resolvable:$true] %s23_s12  ;;  %s47_s15 = int_to_ptr.hbm [resolvable:$true] %s46_s15 }
   0x8   :  { %26 = dma.hbm_to_vmem [thread:$0]  %s22_s8, 32, %s24_s12, [#allocation3]  }
   0x9   :  { %s61_s17 = sshll.u32 %s436_s5, 4  ;;  %s364_s18 = smov [#allocation7]   ;;  %s62_s17 = int_to_ptr.hbm [resolvable:$true] %s61_s17 }
   0xa   :  { %s48_s19 = sshll.u32 %s364_s18, 4  ;;  %s365_s0 = smov [#allocation8]   ;;  %s49_s19 = int_to_ptr.vmem [resolvable:$true] %s48_s19 }
   0xb   :  { %54 = dma.hbm_to_vmem [thread:$0]  %s47_s15, 2048, %s49_s19, [#allocation6], %s361_s9, %s361_s9, %s362_s10  }
   0xc   :  { %s63_s20 = sshll.u32 %s365_s0, 4  ;;  %s64_s20 = int_to_ptr.vmem [resolvable:$true] %s63_s20 }
   0xd   :  { %69 = dma.hbm_to_vmem [thread:$0]  %s62_s17, 2048, %s64_s20, [#allocation9], %s361_s9, %s361_s9, %s362_s10  }
   0xe   :  { %352 = dma.done.wait [#allocation3], 32  }
   0xf   :  { %353 = vsyncadd [#allocation3], 4294967264 }
  0x10   :  { %354 = dma.done.wait [#allocation6], 2304  }
  0x11   :  { %355 = vsyncadd [#allocation6], 4294964992 }
  0x12   :  { %356 = dma.done.wait [#allocation9], 2048  }
  0x13   :  { %357 = vsyncadd [#allocation9], 4294965248  ;;  %v90_v0 = vld [vmem:[#allocation5 + $0x8] sm:$0xff]  ;;  %v89_v1 = vld [vmem:[#allocation5] sm:$0xff]  ;;  %vm95_vm0 = vcmask 130048   ;;  %s366_s24 = smov [#allocation10]  }
  0x14   :  { %113 = vmatpush.msra.mxu0 %v90_v0  ;;  %v88_v2 = vld [vmem:[#allocation2] sm:$0x3]  ;;  %v135_v3 = vld [vmem:[#allocation7 + $0x78] sm:$0xff]  ;;  %v134_v4 = vld [vmem:[#allocation7 + $0x70] sm:$0xff]  ;;  %s207_s25 = sshll.u32 %s366_s24, 4  ;;  %s209_s28 = sshll.u32 %s438_s7, 4  ;;  %s208_s25 = int_to_ptr.vmem [resolvable:$true] %s207_s25  ;;  %s210_s28 = int_to_ptr.hbm [resolvable:$true] %s209_s28 }
  0x15   :  { %140 = vmatpush.msra.mxu1 %v135_v3  ;;  %v133_v5 = vld [vmem:[#allocation7 + $0x68] sm:$0xff]  ;;  %v132_v6 = vld [vmem:[#allocation7 + $0x60] sm:$0xff]  ;;  %v131_v7 = vld [vmem:[#allocation7 + $0x58] sm:$0xff] }
  0x16   :  { %114 = vmatpush.msra.mxu0 %v89_v1  ;;  %v130_v8 = vld [vmem:[#allocation7 + $0x50] sm:$0xff]  ;;  %v129_v9 = vld [vmem:[#allocation7 + $0x48] sm:$0xff]  ;;  %v128_v10 = vld [vmem:[#allocation7 + $0x40] sm:$0xff] }
  0x17   :  { %221 = vmatmul.msk.f32.vlgmr.msra.gmra.mxu0 %vm95_vm0, %v88_v2  ;;  %141 = vmatpush.msra.mxu1 %v134_v4  ;;  %v127_v11 = vld [vmem:[#allocation7 + $0x38] sm:$0xff]  ;;  %v126_v12 = vld [vmem:[#allocation7 + $0x30] sm:$0xff]  ;;  %v125_v13 = vld [vmem:[#allocation7 + $0x28] sm:$0xff] }
  0x18   :  { %v124_v14 = vld [vmem:[#allocation7 + $0x20] sm:$0xff]  ;;  %v123_v15 = vld [vmem:[#allocation7 + $0x18] sm:$0xff]  ;;  %v122_v16 = vld [vmem:[#allocation7 + $0x10] sm:$0xff] }
  0x19   :  { %142 = vmatpush.msra.mxu1 %v133_v5  ;;  %v121_v17 = vld [vmem:[#allocation7 + $0x8] sm:$0xff]  ;;  %v120_v18 = vld [vmem:[#allocation7] sm:$0xff]  ;;  %v176_v19 = vld [vmem:[#allocation8 + $0x78] sm:$0xff] }
  0x1a   :  { %v175_v20 = vld [vmem:[#allocation8 + $0x70] sm:$0xff]  ;;  %181 = vmatpush.msra.mxu2 %v176_v19  ;;  %v174_v21 = vld [vmem:[#allocation8 + $0x68] sm:$0xff]  ;;  %v173_v22 = vld [vmem:[#allocation8 + $0x60] sm:$0xff] }
  0x1b   :  { %143 = vmatpush.msra.mxu1 %v132_v6  ;;  %v172_v23 = vld [vmem:[#allocation8 + $0x58] sm:$0xff]  ;;  %v171_v24 = vld [vmem:[#allocation8 + $0x50] sm:$0xff]  ;;  %v170_v25 = vld [vmem:[#allocation8 + $0x48] sm:$0xff] }
  0x1c   :  { %182 = vmatpush.msra.mxu2 %v175_v20  ;;  %v169_v26 = vld [vmem:[#allocation8 + $0x40] sm:$0xff]  ;;  %v168_v27 = vld [vmem:[#allocation8 + $0x38] sm:$0xff]  ;;  %v167_v28 = vld [vmem:[#allocation8 + $0x30] sm:$0xff] }
  0x1d   :  { %144 = vmatpush.msra.mxu1 %v131_v7  ;;  %v166_v29 = vld [vmem:[#allocation8 + $0x28] sm:$0xff]  ;;  %v165_v30 = vld [vmem:[#allocation8 + $0x20] sm:$0xff]  ;;  %v164_v31 = vld [vmem:[#allocation8 + $0x18] sm:$0xff] }
  0x1e   :  { %183 = vmatpush.msra.mxu2 %v174_v21  ;;  %v229_v32 = vld [vmem:[%s433_s2] ss:$0 sm:$0xff]  ;;  %v163_v36 = vld [vmem:[#allocation8 + $0x10] sm:$0xff]  ;;  %v161_v38 = vld [vmem:[#allocation8] sm:$0xff] }
  0x1f   :  { %145 = vmatpush.msra.mxu1 %v130_v8  ;;  %v162_v37 = vld [vmem:[#allocation8 + $0x8] sm:$0xff] }
  0x20   :  { %184 = vmatpush.msra.mxu2 %v173_v22  ;;  %v230_v39 = vld [vmem:[%s435_s4] ss:$0 sm:$0xff] }
  0x21   :  { %146 = vmatpush.msra.mxu1 %v129_v9  ;;  %v231_v43 = vld [vmem:[%s437_s6] ss:$0 sm:$0xff] }
  0x22   :  { %185 = vmatpush.msra.mxu2 %v172_v23 }
  0x23   :  { %147 = vmatpush.msra.mxu1 %v128_v10 }
  0x24   :  { %186 = vmatpush.msra.mxu2 %v171_v24 }
  0x25   :  { %148 = vmatpush.msra.mxu1 %v127_v11 }
  0x26   :  { %187 = vmatpush.msra.mxu2 %v170_v25 }
  0x27   :  { %149 = vmatpush.msra.mxu1 %v126_v12 }
  0x28   :  { %188 = vmatpush.msra.mxu2 %v169_v26 }
  0x29   :  { %150 = vmatpush.msra.mxu1 %v125_v13 }
  0x2a   :  { %189 = vmatpush.msra.mxu2 %v168_v27 }
  0x2b   :  { %151 = vmatpush.msra.mxu1 %v124_v14 }
  0x2c   :  { %190 = vmatpush.msra.mxu2 %v167_v28 }
  0x2d   :  { %152 = vmatpush.msra.mxu1 %v123_v15 }
  0x2e   :  { %191 = vmatpush.msra.mxu2 %v166_v29 }
  0x2f   :  { %153 = vmatpush.msra.mxu1 %v122_v16 }
  0x30   :  { %192 = vmatpush.msra.mxu2 %v165_v30 }
  0x31   :  { %154 = vmatpush.msra.mxu1 %v121_v17 }
  0x32   :  { %193 = vmatpush.msra.mxu2 %v164_v31 }
  0x33   :  { %155 = vmatpush.msra.mxu1 %v120_v18 }
  0x34   :  { %194 = vmatpush.msra.mxu2 %v163_v36 }
  0x36   :  { %195 = vmatpush.msra.mxu2 %v162_v37 }
  0x38   :  { %196 = vmatpush.msra.mxu2 %v161_v38 }
  0x94   :  { %v116_v33 = vpop.f32.mrf.mxu0 }
  0x95   :  { %v117_v34 = vadd.f32 %v229_v32, %v116_v33 }
  0x97   :  { %v119_v35 = vmax.f32 %v117_v34, 0.0 }
  0x99   :  { %156 = vmatmul.f32.vlgmr.msra.gmra.mxu1 %v119_v35 }
 0x116   :  { %v157_v40 = vpop.f32.mrf.mxu1 }
 0x117   :  { %v158_v41 = vadd.f32 %v230_v39, %v157_v40 }
 0x119   :  { %v160_v42 = vmax.f32 %v158_v41, 0.0 }
 0x11b   :  { %197 = vmatmul.f32.vlgmr.msra.gmra.mxu2 %v160_v42 }
 0x19e   :  { %v198_v44 = vpop.f32.mrf.mxu2 }
 0x19f   :  { %v199_v45 = vadd.f32 %v231_v43, %v198_v44 }
 0x1a1   :  { %201 = vst [vmem:[#allocation10] sm:$0x3] %v199_v45 }
 0x1a2   :  { %212 = dma.vmem_to_hbm [thread:$0]  %s208_s25, 32, %s210_s28, [#allocation4]  }
 0x1a3   :  { %358 = dma.done.wait [#allocation4], 32  }
 0x1a4   :  { %359 = vsyncadd [#allocation4], 4294967264 }
 0x1a5   :  { %217 = vsyncpa [#allocation3], 1 }
 0x1a6   :  { %218 = vsyncpa [#allocation6], 1 }
 0x1a7   :  { %219 = vsyncpa [#allocation9], 1 }
 0x1a8   :  { %220 = vsyncpa [#allocation4], 1 }

// kernel: tpu_custom_call.1
= control target key start
LH: loop header
LB: loop body
LE: loop exit
PB: predicated region body
PF: predicated region fallthrough
CT: control target
= control target key end

     0   :  { %12 = vsyncpa [#allocation3], 0  ;;  %s431_s0 = inlined_call_operand.hbm [shape: f32[2,16], index: 0, kind: input, shape index: {}]   ;;  %s432_s1 = inlined_call_operand.hbm [shape: f32[16,128], index: 1, kind: input, shape index: {}]   ;;  %s433_s2 = inlined_call_operand.vmem [shape: f32[1,128], index: 2, kind: input, shape index: {}]   ;;  %s434_s3 = inlined_call_operand.hbm [shape: f32[128,128], index: 3, kind: input, shape index: {}]   ;;  %s435_s4 = inlined_call_operand.vmem [shape: f32[1,128], index: 4, kind: input, shape index: {}]   ;;  %s436_s5 = inlined_call_operand.hbm [shape: f32[128,128], index: 5, kind: input, shape index: {}]   ;;  %s437_s6 = inlined_call_operand.vmem [shape: f32[1,128], index: 6, kind: input, shape index: {}]   ;;  %s438_s7 = inlined_call_operand.hbm [shape: f32[2,128], index: 7, kind: output, shape index: {}]  }
   0x1   :  { %13 = vsyncpa [#allocation6], 0 }
   0x2   :  { %14 = vsyncpa [#allocation9], 0  ;;  %s31_s26 = sshll.u32 %s432_s1, 4  ;;  %s32_s26 = int_to_ptr.hbm [resolvable:$true] %s31_s26 }
   0x3   :  { %15 = vsyncpa [#allocation4], 0  ;;  %s360_s27 = smov [#allocation5]   ;;  %s21_s8 = sshll.u32 %s431_s0, 4  ;;  %s22_s8 = int_to_ptr.hbm [resolvable:$true] %s21_s8 }
   0x4   :  { %s33_s28 = sshll.u32 %s360_s27, 4  ;;  %s361_s9 = smov 128   ;;  %s34_s28 = int_to_ptr.vmem [resolvable:$true] %s33_s28 }
   0x5   :  { %s362_s10 = smov 8   ;;  %s363_s11 = smov [#allocation2]  }
   0x6   :  { %39 = dma.hbm_to_vmem [thread:$0]  %s32_s26, 256, %s34_s28, [#allocation6], %s361_s9, %s361_s9, %s362_s10  }
   0x7   :  { %s23_s12 = sshll.u32 %s363_s11, 4  ;;  %s46_s15 = sshll.u32 %s434_s3, 4  ;;  %s24_s12 = int_to_ptr.vmem [resolvable:$true] %s23_s12  ;;  %s47_s15 = int_to_ptr.hbm [resolvable:$true] %s46_s15 }
   0x8   :  { %26 = dma.hbm_to_vmem [thread:$0]  %s22_s8, 32, %s24_s12, [#allocation3]  }
   0x9   :  { %s61_s17 = sshll.u32 %s436_s5, 4  ;;  %s364_s18 = smov [#allocation7]   ;;  %s62_s17 = int_to_ptr.hbm [resolvable:$true] %s61_s17 }
   0xa   :  { %s48_s19 = sshll.u32 %s364_s18, 4  ;;  %s365_s0 = smov [#allocation8]   ;;  %s49_s19 = int_to_ptr.vmem [resolvable:$true] %s48_s19 }
   0xb   :  { %54 = dma.hbm_to_vmem [thread:$0]  %s47_s15, 2048, %s49_s19, [#allocation6], %s361_s9, %s361_s9, %s362_s10  }
   0xc   :  { %s63_s20 = sshll.u32 %s365_s0, 4  ;;  %s64_s20 = int_to_ptr.vmem [resolvable:$true] %s63_s20 }
   0xd   :  { %69 = dma.hbm_to_vmem [thread:$0]  %s62_s17, 2048, %s64_s20, [#allocation9], %s361_s9, %s361_s9, %s362_s10  }
   0xe   :  { %352 = dma.done.wait [#allocation3], 32  }
   0xf   :  { %353 = vsyncadd [#allocation3], 4294967264 }
  0x10   :  { %354 = dma.done.wait [#allocation6], 2304  }
  0x11   :  { %355 = vsyncadd [#allocation6], 4294964992 }
  0x12   :  { %356 = dma.done.wait [#allocation9], 2048  }
  0x13   :  { %357 = vsyncadd [#allocation9], 4294965248  ;;  %v90_v0 = vld [vmem:[#allocation5 + $0x8] sm:$0xff]  ;;  %v89_v1 = vld [vmem:[#allocation5] sm:$0xff]  ;;  %vm95_vm0 = vcmask 130048   ;;  %s366_s24 = smov [#allocation10]  }
  0x14   :  { %113 = vmatpush.msra.mxu0 %v90_v0  ;;  %v88_v2 = vld [vmem:[#allocation2] sm:$0x3]  ;;  %v135_v3 = vld [vmem:[#allocation7 + $0x78] sm:$0xff]  ;;  %v134_v4 = vld [vmem:[#allocation7 + $0x70] sm:$0xff]  ;;  %s207_s25 = sshll.u32 %s366_s24, 4  ;;  %s209_s28 = sshll.u32 %s438_s7, 4  ;;  %s208_s25 = int_to_ptr.vmem [resolvable:$true] %s207_s25  ;;  %s210_s28 = int_to_ptr.hbm [resolvable:$true] %s209_s28 }
  0x15   :  { %140 = vmatpush.msra.mxu1 %v135_v3  ;;  %v133_v5 = vld [vmem:[#allocation7 + $0x68] sm:$0xff]  ;;  %v132_v6 = vld [vmem:[#allocation7 + $0x60] sm:$0xff]  ;;  %v131_v7 = vld [vmem:[#allocation7 + $0x58] sm:$0xff] }
  0x16   :  { %114 = vmatpush.msra.mxu0 %v89_v1  ;;  %v130_v8 = vld [vmem:[#allocation7 + $0x50] sm:$0xff]  ;;  %v129_v9 = vld [vmem:[#allocation7 + $0x48] sm:$0xff]  ;;  %v128_v10 = vld [vmem:[#allocation7 + $0x40] sm:$0xff] }
  0x17   :  { %221 = vmatmul.msk.f32.vlgmr.msra.gmra.mxu0 %vm95_vm0, %v88_v2  ;;  %141 = vmatpush.msra.mxu1 %v134_v4  ;;  %v127_v11 = vld [vmem:[#allocation7 + $0x38] sm:$0xff]  ;;  %v126_v12 = vld [vmem:[#allocation7 + $0x30] sm:$0xff]  ;;  %v125_v13 = vld [vmem:[#allocation7 + $0x28] sm:$0xff] }
  0x18   :  { %v124_v14 = vld [vmem:[#allocation7 + $0x20] sm:$0xff]  ;;  %v123_v15 = vld [vmem:[#allocation7 + $0x18] sm:$0xff]  ;;  %v122_v16 = vld [vmem:[#allocation7 + $0x10] sm:$0xff] }
  0x19   :  { %142 = vmatpush.msra.mxu1 %v133_v5  ;;  %v121_v17 = vld [vmem:[#allocation7 + $0x8] sm:$0xff]  ;;  %v120_v18 = vld [vmem:[#allocation7] sm:$0xff]  ;;  %v176_v19 = vld [vmem:[#allocation8 + $0x78] sm:$0xff] }
  0x1a   :  { %v175_v20 = vld [vmem:[#allocation8 + $0x70] sm:$0xff]  ;;  %181 = vmatpush.msra.mxu2 %v176_v19  ;;  %v174_v21 = vld [vmem:[#allocation8 + $0x68] sm:$0xff]  ;;  %v173_v22 = vld [vmem:[#allocation8 + $0x60] sm:$0xff] }
  0x1b   :  { %143 = vmatpush.msra.mxu1 %v132_v6  ;;  %v172_v23 = vld [vmem:[#allocation8 + $0x58] sm:$0xff]  ;;  %v171_v24 = vld [vmem:[#allocation8 + $0x50] sm:$0xff]  ;;  %v170_v25 = vld [vmem:[#allocation8 + $0x48] sm:$0xff] }
  0x1c   :  { %182 = vmatpush.msra.mxu2 %v175_v20  ;;  %v169_v26 = vld [vmem:[#allocation8 + $0x40] sm:$0xff]  ;;  %v168_v27 = vld [vmem:[#allocation8 + $0x38] sm:$0xff]  ;;  %v167_v28 = vld [vmem:[#allocation8 + $0x30] sm:$0xff] }
  0x1d   :  { %144 = vmatpush.msra.mxu1 %v131_v7  ;;  %v166_v29 = vld [vmem:[#allocation8 + $0x28] sm:$0xff]  ;;  %v165_v30 = vld [vmem:[#allocation8 + $0x20] sm:$0xff]  ;;  %v164_v31 = vld [vmem:[#allocation8 + $0x18] sm:$0xff] }
  0x1e   :  { %183 = vmatpush.msra.mxu2 %v174_v21  ;;  %v229_v32 = vld [vmem:[%s433_s2] ss:$0 sm:$0xff]  ;;  %v163_v36 = vld [vmem:[#allocation8 + $0x10] sm:$0xff]  ;;  %v161_v38 = vld [vmem:[#allocation8] sm:$0xff] }
  0x1f   :  { %145 = vmatpush.msra.mxu1 %v130_v8  ;;  %v162_v37 = vld [vmem:[#allocation8 + $0x8] sm:$0xff] }
  0x20   :  { %184 = vmatpush.msra.mxu2 %v173_v22  ;;  %v230_v39 = vld [vmem:[%s435_s4] ss:$0 sm:$0xff] }
  0x21   :  { %146 = vmatpush.msra.mxu1 %v129_v9  ;;  %v231_v43 = vld [vmem:[%s437_s6] ss:$0 sm:$0xff] }
  0x22   :  { %185 = vmatpush.msra.mxu2 %v172_v23 }
  0x23   :  { %147 = vmatpush.msra.mxu1 %v128_v10 }
  0x24   :  { %186 = vmatpush.msra.mxu2 %v171_v24 }
  0x25   :  { %148 = vmatpush.msra.mxu1 %v127_v11 }
  0x26   :  { %187 = vmatpush.msra.mxu2 %v170_v25 }
  0x27   :  { %149 = vmatpush.msra.mxu1 %v126_v12 }
  0x28   :  { %188 = vmatpush.msra.mxu2 %v169_v26 }
  0x29   :  { %150 = vmatpush.msra.mxu1 %v125_v13 }
  0x2a   :  { %189 = vmatpush.msra.mxu2 %v168_v27 }
  0x2b   :  { %151 = vmatpush.msra.mxu1 %v124_v14 }
  0x2c   :  { %190 = vmatpush.msra.mxu2 %v167_v28 }
  0x2d   :  { %152 = vmatpush.msra.mxu1 %v123_v15 }
  0x2e   :  { %191 = vmatpush.msra.mxu2 %v166_v29 }
  0x2f   :  { %153 = vmatpush.msra.mxu1 %v122_v16 }
  0x30   :  { %192 = vmatpush.msra.mxu2 %v165_v30 }
  0x31   :  { %154 = vmatpush.msra.mxu1 %v121_v17 }
  0x32   :  { %193 = vmatpush.msra.mxu2 %v164_v31 }
  0x33   :  { %155 = vmatpush.msra.mxu1 %v120_v18 }
  0x34   :  { %194 = vmatpush.msra.mxu2 %v163_v36 }
  0x36   :  { %195 = vmatpush.msra.mxu2 %v162_v37 }
  0x38   :  { %196 = vmatpush.msra.mxu2 %v161_v38 }
  0x94   :  { %v116_v33 = vpop.f32.mrf.mxu0 }
  0x95   :  { %v117_v34 = vadd.f32 %v229_v32, %v116_v33 }
  0x97   :  { %v119_v35 = vmax.f32 %v117_v34, 0.0 }
  0x99   :  { %156 = vmatmul.f32.vlgmr.msra.gmra.mxu1 %v119_v35 }
 0x116   :  { %v157_v40 = vpop.f32.mrf.mxu1 }
 0x117   :  { %v158_v41 = vadd.f32 %v230_v39, %v157_v40 }
 0x119   :  { %v160_v42 = vmax.f32 %v158_v41, 0.0 }
 0x11b   :  { %197 = vmatmul.f32.vlgmr.msra.gmra.mxu2 %v160_v42 }
 0x19e   :  { %v198_v44 = vpop.f32.mrf.mxu2 }
 0x19f   :  { %v199_v45 = vadd.f32 %v231_v43, %v198_v44 }
 0x1a1   :  { %201 = vst [vmem:[#allocation10] sm:$0x3] %v199_v45 }
 0x1a2   :  { %212 = dma.vmem_to_hbm [thread:$0]  %s208_s25, 32, %s210_s28, [#allocation4]  }
 0x1a3   :  { %358 = dma.done.wait [#allocation4], 32  }
 0x1a4   :  { %359 = vsyncadd [#allocation4], 4294967264 }
 0x1a5   :  { %217 = vsyncpa [#allocation3], 1 }
 0x1a6   :  { %218 = vsyncpa [#allocation6], 1 }
 0x1a7   :  { %219 = vsyncpa [#allocation9], 1 }
 0x1a8   :  { %220 = vsyncpa [#allocation4], 1 }

</bundles_post_ra>
